<compile_context>
chip_gen: v5e
topology: v5e:2x2
jax: 0.10.0
libtpu: 0.0.40
codegen_flags: <defaults>
</compile_context>

<pallas_src>
import functools

import jax
import jax.numpy as jnp
from jax.experimental import pallas as pl
from jax.experimental.pallas import tpu as pltpu

EPS = 1e-5


# --------------------------------------------------------------------------- #
# Kernels
# --------------------------------------------------------------------------- #
def _fused_kernel(x_ref, gamma_ref, beta_ref, o_ref):
    """Whole tensor resident in VMEM: exact two-pass BN in one kernel."""
    xf = x_ref[...].astype(jnp.float32)
    inv_n = jnp.float32(1.0 / x_ref.shape[0])
    mean = jnp.sum(xf, axis=0, keepdims=True) * inv_n
    xc = xf - mean
    var = jnp.sum(xc * xc, axis=0, keepdims=True) * inv_n
    scale = gamma_ref[...] * jax.lax.rsqrt(var + EPS)
    o_ref[...] = (xc * scale + beta_ref[...]).astype(o_ref.dtype)


def _stats_kernel(x_ref, shift_ref, psum_ref, psumsq_ref, *, n_rows, ragged):
    """Pass 0: per-tile, per-sublane partial sums of (x - shift) and (x - shift)^2.

    Output blocks are distinct per grid step, so the grid axis is fully
    'parallel' (megacore-friendly); the tiny fold happens in plain JAX.
    """
    i = pl.program_id(0)
    tn, d = x_ref.shape
    xc = x_ref[...].astype(jnp.float32) - shift_ref[...]
    if ragged:
        # Mask the unspecified rows of the ragged last tile (where-select so
        # garbage/NaN padding never propagates into the sums).
        rows_left = n_rows - i * tn
        mask = jax.lax.broadcasted_iota(jnp.int32, (tn, d), 0) < rows_left
        xc = jnp.where(mask, xc, 0.0)
    # (tn, D) -> (tn//8, 8, D): sum over leading axis is pure vreg (VPU) adds;
    # the single cross-sublane reduce is deferred to the JAX fold.
    x3 = xc.reshape(tn // 8, 8, d)
    psum_ref[0, :, :] = jnp.sum(x3, axis=0)
    psumsq_ref[0, :, :] = jnp.sum(x3 * x3, axis=0)


def _apply_kernel(x_ref, scale_ref, bias_ref, o_ref):
    """Pass 1: y = x * scale + bias, streamed tile by tile."""
    o_ref[...] = (x_ref[...].astype(jnp.float32) * scale_ref[...]
                  + bias_ref[...]).astype(o_ref.dtype)


# --------------------------------------------------------------------------- #
# Wrapper
# --------------------------------------------------------------------------- #
def _round_up(v, m):
    return ((v + m - 1) // m) * m


def _vmem_capacity_bytes():
    try:
        return int(pltpu.get_tpu_info().vmem_capacity_bytes)
    except Exception:
        return 64 << 20  # conservative fallback (v7x per-TC VMEM)


def fc_batchnorm1d(x, gamma, beta, *, force_streaming=False, max_tile_rows=None):
    """x: (B, L, D); gamma, beta: (D,). Returns (B, L, D). Training-mode BN."""
    B, L, D = x.shape
    N = B * L
    x2 = x.reshape(N, D)  # free: contiguous reshape, no copy
    itemsize = jnp.dtype(x.dtype).itemsize
    vmem_cap = _vmem_capacity_bytes()

    # ---- fused, fully VMEM-resident path (1 read + 1 write of x) ----------
    fused_est = N * D * (2 * itemsize + 8) + (1 << 20)  # in, out, 2x f32 temps
    if (not force_streaming) and fused_est <= vmem_cap // 2:
        vmem_limit = int(min(vmem_cap - (2 << 20),
                             max(16 << 20, fused_est + (4 << 20))))
        gamma_f = gamma.astype(jnp.float32).reshape(1, D)
        beta_f = beta.astype(jnp.float32).reshape(1, D)
        out = pl.pallas_call(
            _fused_kernel,
            out_shape=jax.ShapeDtypeStruct((N, D), x.dtype),
            compiler_params=pltpu.CompilerParams(vmem_limit_bytes=vmem_limit),
        )(x2, gamma_f, beta_f)
        return out.reshape(B, L, D)

    # ---- streaming two-pass path -------------------------------------------
    sub = {1: 32, 2: 16}.get(itemsize, 8)                # dtype sublane tile
    target_tile_bytes = max(4 << 20, min(12 << 20, vmem_cap // 8))
    tn = (target_tile_bytes // (D * itemsize)) // sub * sub
    tn = max(sub, min(tn, _round_up(N, sub)))
    if max_tile_rows is not None:                        # test hook
        tn = max(sub, min(tn, (max_tile_rows // sub) * sub))
    nt = -(-N // tn)
    ragged = (N % tn) != 0

    tile_bytes = tn * D * itemsize
    # 2x double-buffered input + 2x double-buffered output tiles + small vecs.
    vmem_limit = int(min(vmem_cap - (2 << 20),
                         max(16 << 20, 4 * tile_bytes + (4 << 20))))
    # TODO(synk): add lane (D) tiling for extremely wide dims where even a
    # minimal row tile no longer fits the VMEM budget.

    row_spec = pl.BlockSpec((tn, D), lambda i: (i, 0))
    vec_spec = pl.BlockSpec((1, D), lambda i: (0, 0))
    part_spec = pl.BlockSpec((1, 8, D), lambda i: (i, 0, 0))

    # Per-channel shift (first row of x) for numerically stable variance.
    shift = x2[0:1].astype(jnp.float32)

    # Pass 0: per-tile partial sums (fully parallel grid axis).
    psum, psumsq = pl.pallas_call(
        functools.partial(_stats_kernel, n_rows=N, ragged=ragged),
        out_shape=(jax.ShapeDtypeStruct((nt, 8, D), jnp.float32),
                   jax.ShapeDtypeStruct((nt, 8, D), jnp.float32)),
        grid=(nt,),
        in_specs=[row_spec, vec_spec],
        out_specs=(part_spec, part_spec),
        compiler_params=pltpu.CompilerParams(
            dimension_semantics=("parallel",),
            vmem_limit_bytes=vmem_limit),
    )(x2, shift)

    # Tiny per-channel fold + scale/bias in plain JAX (O(nt*8*D) work).
    inv_n = jnp.float32(1.0 / N)
    s1 = jnp.sum(psum, axis=(0, 1)) * inv_n      # E[x - shift]
    s2 = jnp.sum(psumsq, axis=(0, 1)) * inv_n    # E[(x - shift)^2]
    var = jnp.maximum(s2 - s1 * s1, 0.0)         # biased variance
    mean = shift[0] + s1
    scale = gamma.astype(jnp.float32) * jax.lax.rsqrt(var + EPS)
    bias = beta.astype(jnp.float32) - mean * scale
    scale2 = scale.reshape(1, D)
    bias2 = bias.reshape(1, D)

    # Pass 1: y = x * scale + bias.
    out = pl.pallas_call(
        _apply_kernel,
        out_shape=jax.ShapeDtypeStruct((N, D), x.dtype),
        grid=(nt,),
        in_specs=[row_spec, vec_spec, vec_spec],
        out_specs=row_spec,
        compiler_params=pltpu.CompilerParams(
            dimension_semantics=("parallel",),
            vmem_limit_bytes=vmem_limit),
    )(x2, scale2, bias2)

    return out.reshape(B, L, D)


# --------------------------------------------------------------------------- #
# Reference + test
# --------------------------------------------------------------------------- #
def fc_batchnorm1d_ref(x, gamma, beta):
    xf = x.astype(jnp.float32)
    mean = jnp.mean(xf, axis=(0, 1), keepdims=True)
    var = jnp.mean((xf - mean) ** 2, axis=(0, 1), keepdims=True)
    y = (xf - mean) * jax.lax.rsqrt(var + EPS)
    return (y * gamma.reshape(1, 1, -1) + beta.reshape(1, 1, -1)).astype(x.dtype)


if __name__ == "__main__":
    key = jax.random.PRNGKey(0)
    kx, kg, kb, kx2, kg2, kb2 = jax.random.split(key, 6)

    # Small shape -> fused VMEM-resident path.
    B, L, D = 2, 8, 32  # batch, seq, dim
    x = jax.random.normal(kx, (B, L, D), dtype=jnp.float32)
    gamma = 1.0 + 0.1 * jax.random.normal(kg, (D,), dtype=jnp.float32)
    beta = 0.1 * jax.random.normal(kb, (D,), dtype=jnp.float32)
    out = jax.block_until_ready(fc_batchnorm1d(x, gamma, beta))
    ref = fc_batchnorm1d_ref(x, gamma, beta)
    assert out.shape == (B, L, D)
    assert jnp.allclose(out, ref, atol=1e-4, rtol=1e-4), "fused path mismatch"

    # Streaming two-pass path: multi-tile grid with a ragged last tile and
    # non-centered data (exercises masking + shifted-variance stability).
    B2, L2, D2 = 3, 100, 96  # N = 300 rows; tile rows forced to 64 -> 5 tiles
    x_s = 3.0 + jax.random.normal(kx2, (B2, L2, D2), dtype=jnp.float32)
    gamma_s = 1.0 + 0.1 * jax.random.normal(kg2, (D2,), dtype=jnp.float32)
    beta_s = 0.1 * jax.random.normal(kb2, (D2,), dtype=jnp.float32)
    out_s = jax.block_until_ready(
        fc_batchnorm1d(x_s, gamma_s, beta_s,
                       force_streaming=True, max_tile_rows=64))
    ref_s = fc_batchnorm1d_ref(x_s, gamma_s, beta_s)
    assert out_s.shape == (B2, L2, D2)
    assert jnp.allclose(out_s, ref_s, atol=1e-4, rtol=1e-4), "streaming mismatch"

    print("KERNEL_OK")
</pallas_src>

<mosaic_0001>
module attributes {stable_mosaic.version = 11 : i64} {
  func.func @_fused_kernel(%arg0: memref<16x32xf32, #tpu.memory_space<vmem>>, %arg1: memref<1x32xf32, #tpu.memory_space<vmem>>, %arg2: memref<1x32xf32, #tpu.memory_space<vmem>>, %arg3: memref<16x32xf32, #tpu.memory_space<vmem>>) attributes {dimension_semantics = [], scalar_prefetch = 0 : i64, scratch_operands = 0 : i64, tpu.core_type = #tpu.core_type<tc>} {
    %c0 = arith.constant 0 : index
    %c0_0 = arith.constant 0 : index
    %0 = vector.load %arg0[%c0, %c0_0] : memref<16x32xf32, #tpu.memory_space<vmem>>, vector<16x32xf32>
    %cst = arith.constant dense<0.000000e+00> : vector<32xf32>
    %1 = vector.multi_reduction <add>, %0, %cst [0] : vector<16x32xf32> to vector<32xf32>
    %2 = vector.shape_cast %1 : vector<32xf32> to vector<1x32xf32>
    %cst_1 = arith.constant 6.250000e-02 : f32
    %3 = vector.broadcast %cst_1 : f32 to vector<1x32xf32>
    %4 = arith.mulf %2, %3 : vector<1x32xf32>
    %5 = vector.broadcast %4 : vector<1x32xf32> to vector<16x32xf32>
    %6 = arith.subf %0, %5 : vector<16x32xf32>
    %7 = arith.mulf %6, %6 : vector<16x32xf32>
    %cst_2 = arith.constant dense<0.000000e+00> : vector<32xf32>
    %8 = vector.multi_reduction <add>, %7, %cst_2 [0] : vector<16x32xf32> to vector<32xf32>
    %9 = vector.shape_cast %8 : vector<32xf32> to vector<1x32xf32>
    %cst_3 = arith.constant 6.250000e-02 : f32
    %10 = vector.broadcast %cst_3 : f32 to vector<1x32xf32>
    %11 = arith.mulf %9, %10 : vector<1x32xf32>
    %c0_4 = arith.constant 0 : index
    %c0_5 = arith.constant 0 : index
    %12 = vector.load %arg1[%c0_4, %c0_5] : memref<1x32xf32, #tpu.memory_space<vmem>>, vector<1x32xf32>
    %cst_6 = arith.constant 9.99999974E-6 : f32
    %13 = vector.broadcast %cst_6 : f32 to vector<1x32xf32>
    %14 = arith.addf %11, %13 : vector<1x32xf32>
    %15 = math.rsqrt %14 : vector<1x32xf32>
    %16 = arith.mulf %12, %15 : vector<1x32xf32>
    %17 = vector.broadcast %16 : vector<1x32xf32> to vector<16x32xf32>
    %18 = arith.mulf %6, %17 : vector<16x32xf32>
    %c0_7 = arith.constant 0 : index
    %c0_8 = arith.constant 0 : index
    %19 = vector.load %arg2[%c0_7, %c0_8] : memref<1x32xf32, #tpu.memory_space<vmem>>, vector<1x32xf32>
    %20 = vector.broadcast %19 : vector<1x32xf32> to vector<16x32xf32>
    %21 = arith.addf %18, %20 : vector<16x32xf32>
    %c0_9 = arith.constant 0 : index
    %c0_10 = arith.constant 0 : index
    %22 = vector.load %arg3[%c0_9, %c0_10] : memref<16x32xf32, #tpu.memory_space<vmem>>, vector<16x32xf32>
    tpu.vector_store %arg3[%c0_9, %c0_10], %21 {strides = array<i32>} : memref<16x32xf32, #tpu.memory_space<vmem>>, vector<16x32xf32>,
    return
  }
}

</mosaic_0001>

<bundles_post_ra>
// kernel: tpu_custom_call.1
= control target key start
LH: loop header
LB: loop body
LE: loop exit
PB: predicated region body
PF: predicated region fallthrough
CT: control target
= control target key end

     0   :  { %8 = vsyncpa [#allocation3], 0  ;;  %s253_s0 = inlined_call_operand.hbm [shape: f32[16,32], index: 0, kind: input, shape index: {}]   ;;  %s254_s1 = inlined_call_operand.hbm [shape: f32[1,32], index: 1, kind: input, shape index: {}]   ;;  %s255_s2 = inlined_call_operand.vmem [shape: f32[1,32], index: 2, kind: input, shape index: {}]   ;;  %s256_s3 = inlined_call_operand.hbm [shape: f32[16,32], index: 3, kind: output, shape index: {}]  }
   0x1   :  { %9 = vsyncpa [#allocation6], 0 }
   0x2   :  { %10 = vsyncpa [#allocation4], 0  ;;  %s15_s14 = sshll.u32 %s253_s0, 4  ;;  %s204_s15 = smov [#allocation2]   ;;  %s16_s14 = int_to_ptr.hbm [resolvable:$true] %s15_s14 }
   0x3   :  { %s17_s16 = sshll.u32 %s204_s15, 4  ;;  %s29_s19 = sshll.u32 %s254_s1, 4  ;;  %s18_s16 = int_to_ptr.vmem [resolvable:$true] %s17_s16  ;;  %s30_s19 = int_to_ptr.hbm [resolvable:$true] %s29_s19 }
   0x4   :  { %s205_s20 = smov 128   ;;  %s206_s21 = smov 8  }
   0x5   :  { %23 = dma.hbm_to_vmem [thread:$0]  %s16_s14, 256, %s18_s16, [#allocation3], %s205_s20, %s205_s20, %s206_s21  }
   0x6   :  { %s207_s22 = smov [#allocation5]  }
   0x7   :  { %s31_s23 = sshll.u32 %s207_s22, 4  ;;  %s32_s23 = int_to_ptr.vmem [resolvable:$true] %s31_s23 }
   0x8   :  { %34 = dma.hbm_to_vmem [thread:$0]  %s30_s19, 16, %s32_s23, [#allocation6]  }
   0x9   :  { %198 = dma.done.wait [#allocation3], 256  }
   0xa   :  { %199 = vsyncadd [#allocation3], 4294967040 }
   0xb   :  { %200 = dma.done.wait [#allocation6], 16  }
   0xc   :  { %201 = vsyncadd [#allocation6], 4294967280  ;;  %vm47_vm0 = vcmask 261120   ;;  %v45_v0 = vld [vmem:[#allocation2] sm:$0xff]  ;;  %v46_v1 = vld [vmem:[#allocation2 + $0x8] sm:$0xff]  ;;  %s208_s24 = smov [#allocation7]  }
   0xd   :  { %v48_v2 = vsel %vm47_vm0, %v45_v0, 0.0  ;;  %v49_v3 = vsel %vm47_vm0, %v46_v1, 0.0  ;;  %v72_v32 = vld [vmem:[#allocation5] sm:$0x1]  ;;  %v123_v37 = vld [vmem:[%s255_s2] ss:$0 sm:$0xff] }
   0xe   :  { %v50_v4 = vadd.f32 %v49_v3, %v48_v2  ;;  %s102_s25 = sshll.u32 %s208_s24, 4  ;;  %s104_s28 = sshll.u32 %s256_s3, 4  ;;  %s103_s25 = int_to_ptr.vmem [resolvable:$true] %s102_s25  ;;  %s105_s28 = int_to_ptr.hbm [resolvable:$true] %s104_s28 }
  0x10   :  { %v51_v5 = vrot.slane %v50_v4, 4 }
  0x12   :  { %v52_v6 = vadd.f32 %v51_v5, %v50_v4 }
  0x14   :  { %v53_v7 = vrot.slane %v52_v6, 2 }
  0x16   :  { %v54_v8 = vadd.f32 %v53_v7, %v52_v6 }
  0x18   :  { %v55_v9 = vrot.slane %v54_v8, 1 }
  0x1a   :  { %v56_v10 = vadd.f32 %v55_v9, %v54_v8 }
  0x1c   :  { %v57_v11 = vmul.f32 0.0625, %v56_v10 }
  0x1e   :  { %v58_v12 = vsub.f32 %v45_v0, %v57_v11  ;;  %v59_v13 = vsub.f32 %v46_v1, %v57_v11 }
  0x20   :  { %v60_v14 = vmul.f32 %v58_v12, %v58_v12  ;;  %v61_v15 = vmul.f32 %v59_v13, %v59_v13 }
  0x22   :  { %v62_v16 = vsel %vm47_vm0, %v60_v14, 0.0  ;;  %v63_v17 = vsel %vm47_vm0, %v61_v15, 0.0 }
  0x23   :  { %v64_v18 = vadd.f32 %v63_v17, %v62_v16 }
  0x25   :  { %v65_v19 = vrot.slane %v64_v18, 4 }
  0x27   :  { %v66_v20 = vadd.f32 %v65_v19, %v64_v18 }
  0x29   :  { %v67_v21 = vrot.slane %v66_v20, 2 }
  0x2b   :  { %v68_v22 = vadd.f32 %v67_v21, %v66_v20 }
  0x2d   :  { %v69_v23 = vrot.slane %v68_v22, 1 }
  0x2f   :  { %v70_v24 = vadd.f32 %v69_v23, %v68_v22 }
  0x31   :  { %v71_v25 = vmul.f32 0.0625, %v70_v24 }
  0x33   :  { %v73_v26 = vadd.f32 1e-05, %v71_v25 }
  0x35   :  { %124 = vrsqrt.f32 %v73_v26  ;;  %vm80_vm1 = vweird.f32 %v73_v26 }
  0x3b   :  { %v125_v27 = vpop.eup %124 }
  0x3c   :  { %v75_v28 = vmul.f32 %v125_v27, %v73_v26  ;;  %vm81_vm2 = vweird.f32 %v125_v27 }
  0x3d   :  { %vm82_vm3 = vmor %vm80_vm1, %vm81_vm2 }
  0x3e   :  { %v76_v29 = vmul.f32 %v125_v27, %v75_v28 }
  0x40   :  { %v77_v30 = vmul.f32 0.5, %v76_v29 }
  0x42   :  { %v78_v31 = vsub.f32 1.5, %v77_v30 }
  0x44   :  { %v79_v33 = vmul.f32 %v125_v27, %v78_v31 }
  0x46   :  { %v83_v34 = vsel %vm82_vm3, %v125_v27, %v79_v33 }
  0x47   :  { %v84_v35 = vmul.f32 %v83_v34, %v72_v32 }
  0x49   :  { %v86_v36 = vperm.slane %v84_v35, 0 }
  0x4b   :  { %v88_v38 = vmul.f32 %v86_v36, %v58_v12  ;;  %v89_v39 = vmul.f32 %v86_v36, %v59_v13 }
  0x4d   :  { %v94_v40 = vadd.f32 %v123_v37, %v88_v38  ;;  %v95_v41 = vadd.f32 %v123_v37, %v89_v39 }
  0x4f   :  { %96 = vst.msk [vmem:[#allocation7] sm:$0xff] %vm47_vm0, %v94_v40 }
  0x50   :  { %97 = vst.msk [vmem:[#allocation7 + $0x8] sm:$0xff] %vm47_vm0, %v95_v41 }
  0x51   :  { %110 = dma.vmem_to_hbm [thread:$0]  %s103_s25, 256, %s105_s28, [#allocation4], %s205_s20, %s205_s20, %s206_s21  }
  0x52   :  { %202 = dma.done.wait [#allocation4], 256  }
  0x53   :  { %203 = vsyncadd [#allocation4], 4294967040 }
  0x54   :  { %115 = vsyncpa [#allocation3], 1 }
  0x55   :  { %116 = vsyncpa [#allocation6], 1 }
  0x56   :  { %117 = vsyncpa [#allocation4], 1 }

</bundles_post_ra>
